<compile_context>
chip_gen: v7x
topology: tpu7x:2x2x1
jax: 0.10.0
libtpu: 0.0.40
codegen_flags: <defaults>
</compile_context>

<pallas_src>
import functools

import jax
import jax.numpy as jnp
from jax.experimental import pallas as pl
from jax.experimental.pallas import tpu as pltpu


CONTEXT_DIM = 6
N_AGENTS = 3
HIDDEN_DIM = 32
FUSED_W = N_AGENTS + HIDDEN_DIM        # 35: [expertise | linear1] columns
OUT_W = 4 * N_AGENTS                   # 12: [gw | es | cs | comb] columns
TEMPERATURE = 1.0
MIN_WEIGHT = 0.01
MAX_WEIGHT = 0.99
BN_EPS = 1e-5
MAX_BATCH_TILE = 2048  # ~5 MiB double-buffered VMEM footprint; safe on v5e/v6e/v7x


def _gating_kernel(
    xin_ref,       # (TB, 9) = [context | conf]   or (TB, 6) when has_conf=False
    wf_ref,        # (6, 35)  fused [expertise.T | W1], BN-folded
    bf_ref,        # (1, 35)  fused [es_bias | b1], BN-folded
    w2_ref,        # (32, 3)
    b2_ref,        # (1, 3)
    out_ref,       # (TB, 12) = [gating_weights | expertise | context | combined]
    *,
    temperature: float,
    min_weight: float,
    max_weight: float,
    has_conf: bool,
):
    xin = xin_ref[...].astype(jnp.float32)
    x = xin[:, :CONTEXT_DIM]

    # Fused first stage (single MXU pass): y = x @ [E.T | W1] + [b_es | b1]
    y = jnp.dot(x, wf_ref[...], preferred_element_type=jnp.float32) + bf_ref[...]
    es = y[:, :N_AGENTS]                       # expertise scores
    h = jnp.maximum(y[:, N_AGENTS:], 0.0)      # ReLU (Dropout = identity, eval)

    cs = jnp.dot(h, w2_ref[...], preferred_element_type=jnp.float32) + b2_ref[...]

    comb = es + cs
    if has_conf:
        comb = comb * xin[:, CONTEXT_DIM:CONTEXT_DIM + N_AGENTS]

    # Temperature-scaled softmax (row-local), clamp, renormalize.
    scaled = comb * (1.0 / temperature)
    m = jnp.max(scaled, axis=-1, keepdims=True)
    e = jnp.exp(scaled - m)
    p = e * pl.reciprocal(jnp.sum(e, axis=-1, keepdims=True), approx=False)
    p = jnp.clip(p, min_weight, max_weight)
    p = p * pl.reciprocal(jnp.sum(p, axis=-1, keepdims=True), approx=False)

    out_ref[...] = jnp.concatenate([p, es, cs, comb], axis=-1)


def fold_params(params, apply_bn: bool):
    """One-time host-side fold of eval-mode BatchNorm into the first-stage weights."""
    dt = jnp.float32
    if apply_bn:
        s = (params["bn_gamma"] / jnp.sqrt(params["bn_var"] + BN_EPS)).astype(dt)
        t = (params["bn_beta"] - params["bn_mean"] * s).astype(dt)
    else:
        s = jnp.ones((CONTEXT_DIM,), dt)
        t = jnp.zeros((CONTEXT_DIM,), dt)

    exp_t = params["expertise"].astype(dt).T          # (6, 3)
    w1 = params["w1"].astype(dt)                      # (6, 32)

    w_es = s[:, None] * exp_t                         # (6, 3)
    b_es = t @ exp_t                                  # (3,)
    w1f = s[:, None] * w1                             # (6, 32)
    b1f = params["b1"].astype(dt) + t @ w1            # (32,)

    return {
        "w_fused": jnp.concatenate([w_es, w1f], axis=1),               # (6, 35)
        "b_fused": jnp.concatenate([b_es, b1f]).reshape(1, FUSED_W),   # (1, 35)
        "w2": params["w2"].astype(dt),                                 # (32, 3)
        "b2": params["b2"].astype(dt).reshape(1, N_AGENTS),            # (1, 3)
    }


def gating_network_forward(
    shared_context,            # (B, 6) f32
    params,                    # raw params (see init_params)
    agent_confidences=None,    # optional (B, 3) f32
    temperature_override=None,
):
    dt = jnp.float32
    B = shared_context.shape[0]

    # PyTorch forward skips BatchNorm entirely for batch_size == 1.
    folded = fold_params(params, apply_bn=(B > 1))

    temp = float(temperature_override) if temperature_override is not None else TEMPERATURE
    has_conf = agent_confidences is not None

    if has_conf:
        xin = jnp.concatenate(
            [shared_context.astype(dt), agent_confidences.astype(dt)], axis=1
        )                                    # (B, 9)
    else:
        xin = shared_context.astype(dt)      # (B, 6)
    in_w = xin.shape[1]

    # Batch tile: multiple of 8, capped for v7x VMEM headroom.
    tb = min(MAX_BATCH_TILE, ((B + 7) // 8) * 8)
    grid = (pl.cdiv(B, tb),)

    kernel = functools.partial(
        _gating_kernel,
        temperature=temp,
        min_weight=MIN_WEIGHT,
        max_weight=MAX_WEIGHT,
        has_conf=has_conf,
    )

    packed = pl.pallas_call(
        kernel,
        out_shape=jax.ShapeDtypeStruct((B, OUT_W), dt),
        grid=grid,
        in_specs=[
            # Batch-tiled activations.
            pl.BlockSpec((tb, in_w), lambda i: (i, 0)),
            # Tiny weights: whole-array blocks, constant index_map -> stay resident.
            pl.BlockSpec((CONTEXT_DIM, FUSED_W), lambda i: (0, 0)),
            pl.BlockSpec((1, FUSED_W), lambda i: (0, 0)),
            pl.BlockSpec((HIDDEN_DIM, N_AGENTS), lambda i: (0, 0)),
            pl.BlockSpec((1, N_AGENTS), lambda i: (0, 0)),
        ],
        out_specs=pl.BlockSpec((tb, OUT_W), lambda i: (i, 0)),
        compiler_params=pltpu.CompilerParams(
            dimension_semantics=("parallel",),  # lets v7x split batch across 2 TCs
        ),
    )(xin, folded["w_fused"], folded["b_fused"], folded["w2"], folded["b2"])

    return {
        "gating_weights": packed[:, 0:N_AGENTS],
        "expertise_scores": packed[:, N_AGENTS:2 * N_AGENTS],
        "context_scores": packed[:, 2 * N_AGENTS:3 * N_AGENTS],
        "combined_scores": packed[:, 3 * N_AGENTS:OUT_W],
    }


def init_params(key):
    """Deterministic parameter init matching the PyTorch module's __init__."""
    k1, k2 = jax.random.split(key, 2)

    def xavier_uniform(k, fan_in, fan_out):
        a = (6.0 / (fan_in + fan_out)) ** 0.5
        # stored as (in, out) for direct x @ W
        return jax.random.uniform(k, (fan_in, fan_out), jnp.float32, -a, a)

    expertise = jnp.array(
        [[0.3, 0.2, 0.3, 0.1, 0.05, 0.05],
         [0.1, 0.1, 0.1, 0.3, 0.3, 0.1],
         [0.2, 0.3, 0.2, 0.1, 0.1, 0.1]],
        jnp.float32,
    )

    return {
        "w1": xavier_uniform(k1, CONTEXT_DIM, HIDDEN_DIM),
        "b1": jnp.zeros((HIDDEN_DIM,), jnp.float32),
        "w2": xavier_uniform(k2, HIDDEN_DIM, N_AGENTS),
        "b2": jnp.zeros((N_AGENTS,), jnp.float32),
        "expertise": expertise,
        # BatchNorm1d running stats / affine at init:
        "bn_mean": jnp.zeros((CONTEXT_DIM,), jnp.float32),
        "bn_var": jnp.ones((CONTEXT_DIM,), jnp.float32),
        "bn_gamma": jnp.ones((CONTEXT_DIM,), jnp.float32),
        "bn_beta": jnp.zeros((CONTEXT_DIM,), jnp.float32),
    }


def _reference_forward(x, params, conf, temp):
    """Pure-JAX reference for a sanity check (eval-mode semantics)."""
    B = x.shape[0]
    if B > 1:
        inv_std = 1.0 / jnp.sqrt(params["bn_var"] + BN_EPS)
        xn = (x - params["bn_mean"]) * inv_std * params["bn_gamma"] + params["bn_beta"]
    else:
        xn = x
    es = xn @ params["expertise"].T
    h = jnp.maximum(xn @ params["w1"] + params["b1"], 0.0)
    cs = h @ params["w2"] + params["b2"]
    comb = es + cs
    if conf is not None:
        comb = comb * conf
    p = jax.nn.softmax(comb / temp, axis=-1)
    p = jnp.clip(p, MIN_WEIGHT, MAX_WEIGHT)
    p = p / jnp.sum(p, axis=-1, keepdims=True)
    return p, es, cs, comb


def _check(out, ref, atol=1e-5):
    ref_gw, ref_es, ref_cs, ref_comb = ref
    assert jnp.allclose(out["gating_weights"], ref_gw, atol=atol)
    assert jnp.allclose(out["expertise_scores"], ref_es, atol=atol)
    assert jnp.allclose(out["context_scores"], ref_cs, atol=atol)
    assert jnp.allclose(out["combined_scores"], ref_comb, atol=atol)


if __name__ == "__main__":
    key = jax.random.PRNGKey(0)
    k_params, k_x, k_conf = jax.random.split(key, 3)

    params = init_params(k_params)

    # Case 1: batch=4, with agent confidences.
    batch = 4
    shared_context = jax.random.normal(k_x, (batch, CONTEXT_DIM), jnp.float32)
    agent_conf = jax.random.uniform(k_conf, (batch, N_AGENTS), jnp.float32, 0.5, 1.0)

    out = gating_network_forward(shared_context, params, agent_conf)
    jax.block_until_ready(out)
    _check(out, _reference_forward(shared_context, params, agent_conf, TEMPERATURE))

    # Case 2: batch=5 (non multiple of 8 -> partial block), no confidences
    # (exercises the conf-less kernel variant).
    batch2 = 5
    x2 = jax.random.normal(jax.random.PRNGKey(1), (batch2, CONTEXT_DIM), jnp.float32)
    out2 = gating_network_forward(x2, params, None)
    jax.block_until_ready(out2)
    _check(out2, _reference_forward(x2, params, None, TEMPERATURE))

    print("KERNEL_OK")
</pallas_src>

<mosaic_0001>
module attributes {stable_mosaic.version = 11 : i64} {
  func.func @_gating_kernel(%arg0: i32, %arg1: memref<8x9xf32, #tpu.memory_space<vmem>>, %arg2: memref<6x35xf32, #tpu.memory_space<vmem>>, %arg3: memref<1x35xf32, #tpu.memory_space<vmem>>, %arg4: memref<32x3xf32, #tpu.memory_space<vmem>>, %arg5: memref<1x3xf32, #tpu.memory_space<vmem>>, %arg6: memref<8x12xf32, #tpu.memory_space<vmem>>) attributes {dimension_semantics = [#tpu.dimension_semantics<parallel>], iteration_bounds = array<i64: 1>, scalar_prefetch = 0 : i64, scratch_operands = 0 : i64, tpu.core_type = #tpu.core_type<tc>, window_params = [{transform_indices = @transform_0, window_bounds = array<i64: 8, 9>}, {pipeline_mode = #tpu.pipeline_mode<synchronous>, transform_indices = @transform_1, window_bounds = array<i64: 6, 35>}, {pipeline_mode = #tpu.pipeline_mode<synchronous>, transform_indices = @transform_2, window_bounds = array<i64: 1, 35>}, {pipeline_mode = #tpu.pipeline_mode<synchronous>, transform_indices = @transform_3, window_bounds = array<i64: 32, 3>}, {pipeline_mode = #tpu.pipeline_mode<synchronous>, transform_indices = @transform_4, window_bounds = array<i64: 1, 3>}, {transform_indices = @transform_5, window_bounds = array<i64: 8, 12>}]} {
    %c0 = arith.constant 0 : index
    %c0_0 = arith.constant 0 : index
    %0 = vector.load %arg1[%c0, %c0_0] : memref<8x9xf32, #tpu.memory_space<vmem>>, vector<8x9xf32>
    %1 = vector.extract_strided_slice %0 {offsets = [0, 0], sizes = [8, 6], strides = [1, 1]} : vector<8x9xf32> to vector<8x6xf32>
    %c0_1 = arith.constant 0 : index
    %c0_2 = arith.constant 0 : index
    %2 = vector.load %arg2[%c0_1, %c0_2] : memref<6x35xf32, #tpu.memory_space<vmem>>, vector<6x35xf32>
    %cst = arith.constant dense<0.000000e+00> : vector<8x35xf32>
    %3 = tpu.matmul %1, %2, %cst {dimension_numbers = #tpu.dot_dimension_numbers<[1], [0], [0], [1], [0, 0, 1, 1], [], []>} : vector<8x6xf32>, vector<6x35xf32>, vector<8x35xf32> -> vector<8x35xf32>
    %c0_3 = arith.constant 0 : index
    %c0_4 = arith.constant 0 : index
    %4 = vector.load %arg3[%c0_3, %c0_4] : memref<1x35xf32, #tpu.memory_space<vmem>>, vector<1x35xf32>
    %5 = vector.broadcast %4 : vector<1x35xf32> to vector<8x35xf32>
    %6 = arith.addf %3, %5 : vector<8x35xf32>
    %7 = vector.extract_strided_slice %6 {offsets = [0, 0], sizes = [8, 3], strides = [1, 1]} : vector<8x35xf32> to vector<8x3xf32>
    %8 = vector.extract_strided_slice %6 {offsets = [0, 3], sizes = [8, 32], strides = [1, 1]} : vector<8x35xf32> to vector<8x32xf32>
    %cst_5 = arith.constant 0.000000e+00 : f32
    %9 = vector.broadcast %cst_5 : f32 to vector<8x32xf32>
    %10 = arith.maximumf %8, %9 : vector<8x32xf32>
    %c0_6 = arith.constant 0 : index
    %c0_7 = arith.constant 0 : index
    %11 = vector.load %arg4[%c0_6, %c0_7] : memref<32x3xf32, #tpu.memory_space<vmem>>, vector<32x3xf32>
    %cst_8 = arith.constant dense<0.000000e+00> : vector<8x3xf32>
    %12 = tpu.matmul %10, %11, %cst_8 {dimension_numbers = #tpu.dot_dimension_numbers<[1], [0], [0], [1], [0, 0, 1, 1], [], []>} : vector<8x32xf32>, vector<32x3xf32>, vector<8x3xf32> -> vector<8x3xf32>
    %c0_9 = arith.constant 0 : index
    %c0_10 = arith.constant 0 : index
    %13 = vector.load %arg5[%c0_9, %c0_10] : memref<1x3xf32, #tpu.memory_space<vmem>>, vector<1x3xf32>
    %14 = vector.broadcast %13 : vector<1x3xf32> to vector<8x3xf32>
    %15 = arith.addf %12, %14 : vector<8x3xf32>
    %16 = arith.addf %7, %15 : vector<8x3xf32>
    %17 = vector.extract_strided_slice %0 {offsets = [0, 6], sizes = [8, 3], strides = [1, 1]} : vector<8x9xf32> to vector<8x3xf32>
    %18 = arith.mulf %16, %17 : vector<8x3xf32>
    %cst_11 = arith.constant 1.000000e+00 : f32
    %19 = vector.broadcast %cst_11 : f32 to vector<8x3xf32>
    %20 = arith.mulf %18, %19 : vector<8x3xf32>
    %cst_12 = arith.constant dense<0xFF800000> : vector<8xf32>
    %21 = vector.multi_reduction <maximumf>, %20, %cst_12 [1] : vector<8x3xf32> to vector<8xf32>
    %22 = vector.shape_cast %21 : vector<8xf32> to vector<8x1xf32>
    %23 = vector.broadcast %22 : vector<8x1xf32> to vector<8x3xf32>
    %24 = arith.subf %20, %23 : vector<8x3xf32>
    %25 = math.exp %24 : vector<8x3xf32>
    %cst_13 = arith.constant dense<0.000000e+00> : vector<8xf32>
    %26 = vector.multi_reduction <add>, %25, %cst_13 [1] : vector<8x3xf32> to vector<8xf32>
    %27 = vector.shape_cast %26 : vector<8xf32> to vector<8x1xf32>
    %28 = tpu.reciprocal %27 : vector<8x1xf32> -> vector<8x1xf32>
    %29 = vector.broadcast %28 : vector<8x1xf32> to vector<8x3xf32>
    %30 = arith.mulf %25, %29 : vector<8x3xf32>
    %cst_14 = arith.constant 0.00999999977 : f32
    %cst_15 = arith.constant 9.900000e-01 : f32
    %31 = vector.broadcast %cst_14 : f32 to vector<8x3xf32>
    %32 = arith.maximumf %31, %30 : vector<8x3xf32>
    %33 = vector.broadcast %cst_15 : f32 to vector<8x3xf32>
    %34 = arith.minimumf %33, %32 : vector<8x3xf32>
    %cst_16 = arith.constant dense<0.000000e+00> : vector<8xf32>
    %35 = vector.multi_reduction <add>, %34, %cst_16 [1] : vector<8x3xf32> to vector<8xf32>
    %36 = vector.shape_cast %35 : vector<8xf32> to vector<8x1xf32>
    %37 = tpu.reciprocal %36 : vector<8x1xf32> -> vector<8x1xf32>
    %38 = vector.broadcast %37 : vector<8x1xf32> to vector<8x3xf32>
    %39 = arith.mulf %34, %38 : vector<8x3xf32>
    %40 = tpu.concatenate %39, %7, %15, %18 in 1 : vector<8x3xf32>, vector<8x3xf32>, vector<8x3xf32>, vector<8x3xf32> -> vector<8x12xf32>
    %c0_17 = arith.constant 0 : index
    %c0_18 = arith.constant 0 : index
    %41 = vector.load %arg6[%c0_17, %c0_18] : memref<8x12xf32, #tpu.memory_space<vmem>>, vector<8x12xf32>
    tpu.vector_store %arg6[%c0_17, %c0_18], %40 {strides = array<i32>} : memref<8x12xf32, #tpu.memory_space<vmem>>, vector<8x12xf32>,
    return
  }
  func.func @transform_0(%arg0: i32) -> (i32, i32) {
    %c0_i32 = arith.constant 0 : i32
    %c0_i32_0 = arith.constant 0 : i32
    return %arg0, %c0_i32 : i32, i32
  }
  func.func @transform_1(%arg0: i32) -> (i32, i32) {
    %c0_i32 = arith.constant 0 : i32
    %c0_i32_0 = arith.constant 0 : i32
    %c0_i32_1 = arith.constant 0 : i32
    return %c0_i32, %c0_i32_0 : i32, i32
  }
  func.func @transform_2(%arg0: i32) -> (i32, i32) {
    %c0_i32 = arith.constant 0 : i32
    %c0_i32_0 = arith.constant 0 : i32
    %c0_i32_1 = arith.constant 0 : i32
    return %c0_i32, %c0_i32_0 : i32, i32
  }
  func.func @transform_3(%arg0: i32) -> (i32, i32) {
    %c0_i32 = arith.constant 0 : i32
    %c0_i32_0 = arith.constant 0 : i32
    %c0_i32_1 = arith.constant 0 : i32
    return %c0_i32, %c0_i32_0 : i32, i32
  }
  func.func @transform_4(%arg0: i32) -> (i32, i32) {
    %c0_i32 = arith.constant 0 : i32
    %c0_i32_0 = arith.constant 0 : i32
    %c0_i32_1 = arith.constant 0 : i32
    return %c0_i32, %c0_i32_0 : i32, i32
  }
  func.func @transform_5(%arg0: i32) -> (i32, i32) {
    %c0_i32 = arith.constant 0 : i32
    %c0_i32_0 = arith.constant 0 : i32
    return %arg0, %c0_i32 : i32, i32
  }
}

</mosaic_0001>

<bundles_post_ra>
// kernel: tpu_custom_call.1
= control target key start
LH: loop header
LB: loop body
LE: loop exit
PB: predicated region body
PF: predicated region fallthrough
CT: control target
= control target key end

     0   :  { %10 = vsyncpa [#allocation3], 0  ;;  %vm34_vm0 = vcmask 1045504   ;;  %v329_v1 = vmov 0.0   ;;  %vm30_vm1 = vcmask 48128   ;;  %vm330_vm2 = vmmov 0   ;;  %s412_s0 = inlined_call_operand.vmem [shape: f32[4,9], index: 0, kind: input, shape index: {}]   ;;  %s413_s1 = inlined_call_operand.vmem [shape: f32[6,35], index: 1, kind: input, shape index: {}]   ;;  %s414_s2 = inlined_call_operand.vmem [shape: f32[1,35], index: 2, kind: input, shape index: {}]   ;;  %s415_s3 = inlined_call_operand.vmem [shape: f32[32,3], index: 3, kind: input, shape index: {}]   ;;  %s416_s4 = inlined_call_operand.vmem [shape: f32[1,3], index: 4, kind: input, shape index: {}]   ;;  %s417_s5 = inlined_call_operand.hbm [shape: f32[4,12], index: 5, kind: output, shape index: {}]  }
   0x1   :  { %v22_v0 = vld [vmem:[%s413_s1] sm:$0x3f]  ;;  %266 = vmatprep.subr.mxu0 %v329_v1  ;;  %268 = vmatprep.mubr.msk.f32.mxu0 %vm330_vm2, %v329_v1  ;;  %v110_v4 = vld [vmem:[%s415_s3 + $0x8] sm:$0xff]  ;;  %v111_v5 = vld [vmem:[%s415_s3 + $0x10] sm:$0xff]  ;;  %v331_v6 = vmov 0.0|0.0   ;;  %s332_s30 = smov 125  }
   0x2   :  { %v21_v2 = vld [vmem:[%s412_s0] sm:$0xff]  ;;  %267 = vmatpush3.msk.msra.mxu0 %vm34_vm0, %v22_v0  ;;  %279 = vmatprep.mubr.msk.f32.mxu1 %vm330_vm2, %v329_v1  ;;  %v112_v8 = vld [vmem:[%s415_s3 + $0x18] sm:$0xff]  ;;  %s333_s6 = smov 122   ;;  %vm123_vm3 = vcmask 261120   ;;  %vm201_vm4 = vcmask 23552   ;;  %s336_s8 = smov 9  }
   0x3   :  { %269 = vmatmul.mubr.msk.f32.vlgmr.msra.gmra.mrb[0].mxu0 %vm30_vm1, %v21_v2  ;;  %v109_v3 = vld [vmem:[%s415_s3] sm:$0xff]  ;;  %282 = vmatprep.subr.bf16.mxu1 %v331_v6  ;;  %v286_v9 = vpack.c.bf16 %v112_v8, %v111_v5  ;;  %vm234_vm5 = vcmask 72704   ;;  %vm236_vm6 = vcmask 97280  }
   0x4   :  { %v283_v7 = vpack.c.bf16 %v110_v4, %v109_v3  ;;  %v254_v10 = vld [vmem:[%s414_s2] ss:$0 sm:$0xff]  ;;  %s334_s2 = smov 3  }
   0x5   :  { %v257_v16 = vld [vmem:[%s416_s4] ss:$0 sm:$0xff]  ;;  %s335_s4 = smov 6  }
   0x6   :  { %284 = vmatpush3.bf16.msra.mxu1 %v283_v7 }
   0x7   :  { %285 = vmatprep.subr.bf16.mxu1 %v331_v6 }
   0xa   :  { %287 = vmatpush3.bf16.msra.mxu1 %v286_v9 }
  0xd6   :  { %v104_v11 = vpop.f32.mrb[0].mxu0 }
  0xd7   :  { %v105_v12 = vadd.f32 %v254_v10, %v104_v11  ;;  %v270_v13 = vpop.f32.mrb[1].mxu0 }
  0xd9   :  { %v108_v14 = vmax.f32 %v105_v12, 0.0 }
  0xdb   :  { %121 = vrot.lane.b32.xlu0 %v108_v14, %s332_s30 }
  0xdf   :  { %197 = vrot.lane.b32.xlu0 %v21_v2, %s333_s6 }
 0x14d   :  { %v122_v15 = vpop.permute.xlu0 %121 }
 0x14e   :  { %280 = vmatmul.mubr.msk.f32.vlgmr.msra.gmra.mrb[0].mxu1 %vm123_vm3, %v122_v15 }
 0x151   :  { %v198_v20 = vpop.permute.xlu0 %197 }
 0x221   :  { %v192_v17 = vpop.f32.mrb[0].mxu1 }
 0x222   :  { %v193_v18 = vadd.f32 %v257_v16, %v192_v17  ;;  %v281_v19 = vpop.f32.mrb[1].mxu1 }
 0x224   :  { %v196_v21 = vadd.f32 %v193_v18, %v105_v12 }
 0x226   :  { %v200_v22 = vmul.f32 %v198_v20, %v196_v21 }
 0x228   :  { %v202_v23 = vsel %vm201_vm4, %v200_v22, -inf }
 0x229   :  { %203 = vmax.xlane.f32.xlu1 %v202_v23 }
 0x2b6   :  { %v204_v24 = vpop.xlane.xlu1 %203 }
 0x2b7   :  { %v205_v25 = vsub.f32 %v200_v22, %v204_v24 }
 0x2b9   :  { %v206_v26 = vmul.f32 1.442695, %v205_v25 }
 0x2bb   :  { %299 = vpow2.f32 %v206_v26 }
 0x2c5   :  { %v300_v27 = vpop.eup %299 }
 0x2c6   :  { %v208_v28 = vsel %vm201_vm4, %v300_v27, 0.0 }
 0x2c7   :  { %209 = vadd.xlane.f32.xlu1 %v208_v28 }
 0x2d8   :  { %221 = vrot.lane.b32.xlu1 %v105_v12, %s334_s2 }
 0x2dc   :  { %225 = vrot.lane.b32.xlu1 %v193_v18, %s335_s4 }
 0x2e0   :  { %229 = vrot.lane.b32.xlu1 %v200_v22, %s336_s8 }
 0x354   :  { %v210_v29 = vpop.xlane.xlu1 %209 }
 0x355   :  { %301 = vrcp.f32 %v210_v29 }
 0x358   :  { %v222_v36 = vpop.permute.xlu1 %221 }
 0x35c   :  { %v226_v37 = vpop.permute.xlu1 %225 }
 0x35f   :  { %v302_v30 = vpop.eup %301 }
 0x360   :  { %v212_v31 = vmul.f32 %v302_v30, %v300_v27  ;;  %v230_v41 = vpop.permute.xlu1 %229 }
 0x362   :  { %v213_v32 = vmax.f32 %v212_v31, 0.01 }
 0x364   :  { %v214_v33 = vmin.f32 %v213_v32, 0.99 }
 0x366   :  { %v215_v34 = vsel %vm201_vm4, %v214_v33, 0.0 }
 0x367   :  { %216 = vadd.xlane.f32.xlu0 %v215_v34 }
 0x3f4   :  { %v217_v35 = vpop.xlane.xlu0 %216 }
 0x3f5   :  { %303 = vrcp.f32 %v217_v35 }
 0x3ff   :  { %v304_v38 = vpop.eup %303 }
 0x400   :  { %v219_v39 = vmul.f32 %v304_v38, %v214_v33 }
 0x402   :  { %v232_v40 = vsel %vm201_vm4, %v219_v39, %v222_v36 }
 0x403   :  { %v233_v42 = vsel %vm30_vm1, %v232_v40, %v226_v37 }
 0x404   :  { %v235_v43 = vsel %vm234_vm5, %v233_v42, %v230_v41 }
 0x405   :  { %237 = vst.msk [vmem:[#allocation2] sm:$0xff] %vm236_vm6, %v235_v43 }
 0x406   :  { %242 = vsyncadd [#allocation3], 64  ;;  %s337_s9 = smov [#allocation2]  }
 0x407   :  { %s243_s10 = sshll.u32 %s337_s9, 4  ;;  %s244_s10 = int_to_ptr.vmem [resolvable:$true] %s243_s10 }
 0x408   :  { %s305_s11 = scalar_lea.vmem %s244_s10, 64  ;;  %s309_s12 = scalar_lea.vmem %s244_s10, 128 }
 0x409   :  { %p306_p0 = scmp.ne.s32.totalorder %s244_s10, %s305_s11  ;;  %p310_p1 = scmp.lt.s32.totalorder %s244_s10, %s244_s10 }
 0x40a   :  { %p311_p2 = scmp.lt.s32.totalorder %s309_s12, %s305_s11 }
 0x40c   :  { %p312_p3 = por %p311_p2, %p310_p1 }
 0x40e   :  { %p313_p4 = pnand %p312_p3, %p306_p0 }
 0x410   :  { %316 = shalt.err (!%p313_p4)
}
 0x411   :  { %s317_s15 = scalar_lea.hbm %s417_s5, 64 }
 0x412   :  { %p318_p5 = scmp.ne.s32.totalorder %s417_s5, %s317_s15  ;;  %p321_p6 = scmp.lt.u32.totalorder %s317_s15, %s417_s5 }
 0x414   :  { %p323_p7 = pnand %p321_p6, %p318_p5 }
 0x416   :  { %326 = shalt.err (!%p323_p7)
}
 0x417   :  { %s338_s20 = smov 64   ;;  %s339_s21 = smov 4  }
 0x418   :  { %249 = dma.vmem_to_hbm [thread:$0]  %s244_s10, 64, %s417_s5, [#allocation3], %s338_s20, %s338_s20, %s339_s21  }
 0x419   :  { %327 = dma.done.wait [#allocation3], 128  }
 0x41a   :  { %328 = vsyncadd [#allocation3], 4294967168 }
 0x41b   :  { %253 = vsyncpa [#allocation3], 1 }

</bundles_post_ra>
